<compile_context>
chip_gen: v7x
topology: tpu7x:2x2x1
jax: 0.10.0
libtpu: 0.0.40
codegen_flags: <defaults>
</compile_context>

<pallas_src>
import functools

import jax
import jax.numpy as jnp
from jax.experimental import pallas as pl
from jax.experimental.pallas import tpu as pltpu


def _round_up(x, m):
    return ((x + m - 1) // m) * m


def _bert_self_output_kernel(x_ref, w_ref, params_ref, res_ref, o_ref, *,
                             eps, compute_dtype):
    # Dense: cast activations to bf16 right before the MXU; accumulate in f32.
    x = x_ref[...].astype(compute_dtype)
    h = jnp.dot(x, w_ref[...], preferred_element_type=jnp.float32)

    p = params_ref[...]                               # (3, H) f32: [bias; gamma; beta]
    # Dropout is identity in eval/inference mode.
    # TODO(synk): training-mode RNG dropout is not implemented.
    h = h + p[0:1, :] + res_ref[...].astype(jnp.float32)   # bias + residual (f32)

    # One-pass LayerNorm statistics over the hidden dim: var = E[h^2] - mean^2.
    mean = jnp.mean(h, axis=-1, keepdims=True)
    meansq = jnp.mean(h * h, axis=-1, keepdims=True)
    var = jnp.maximum(meansq - mean * mean, 0.0)
    out = (h - mean) * jax.lax.rsqrt(var + eps) * p[1:2, :] + p[2:3, :]

    o_ref[...] = out.astype(o_ref.dtype)


def bert_self_output(hidden_states, input_tensor, w, b, gamma, beta, *,
                     eps=1e-12, row_tile=512, compute_dtype=jnp.bfloat16,
                     out_dtype=None):
    """Fused BertSelfOutput forward.

    hidden_states: [B, S, H]   (output of self-attention)
    input_tensor:  [B, S, H]   (residual)
    w: [H, H] (in_features x out_features layout, i.e. already transposed vs
       torch.nn.Linear.weight), b: [H], gamma: [H], beta: [H]
    returns [B, S, H] in out_dtype (default: hidden_states.dtype)
    """
    B, S, H = hidden_states.shape
    assert input_tensor.shape == (B, S, H)
    T = B * S
    out_dtype = hidden_states.dtype if out_dtype is None else out_dtype

    # Activations / residual stay in their native dtype (no wrapper casts).
    x2d = hidden_states.reshape(T, H)
    res2d = input_tensor.reshape(T, H)
    w_c = w.astype(compute_dtype)                                  # small, one-time
    params = jnp.stack([b, gamma, beta], axis=0).astype(jnp.float32)  # (3, H) f32

    # Row tile: multiple of 8 (sublane), clamped for tiny inputs. The token
    # axis does NOT need to divide row_tile: the ragged last block is masked.
    row_tile = max(8, min(row_tile, _round_up(T, 8)))
    grid = (pl.cdiv(T, row_tile),)

    in_item = jnp.dtype(hidden_states.dtype).itemsize
    res_item = jnp.dtype(input_tensor.dtype).itemsize
    w_item = jnp.dtype(compute_dtype).itemsize
    out_item = jnp.dtype(out_dtype).itemsize
    Hp = _round_up(H, 128)

    # VMEM budget: single-buffered weight + params, double-buffered x/res/out
    # tiles, the kernel's f32 intermediates (~3 live (row_tile, H) f32 values),
    # plus slack for Mosaic internal scratch.  Capped at 48 MiB so the same
    # config stays safe on v7x (64 MiB VMEM / TensorCore).
    vmem_bytes = (H * Hp * w_item                       # weight (single-buffered)
                  + 2 * row_tile * Hp * in_item         # x tiles
                  + 2 * row_tile * Hp * res_item        # residual tiles
                  + 2 * row_tile * Hp * out_item        # output tiles
                  + 8 * Hp * 4                          # params (padded)
                  + 3 * row_tile * Hp * 4               # f32 intermediates
                  + (2 << 20))                          # slack
    vmem_bytes = int(min(max(vmem_bytes, 16 << 20), 48 << 20))

    cost = pl.CostEstimate(
        flops=2 * T * H * H,
        transcendentals=T,                               # one rsqrt per row
        bytes_accessed=(T * H * in_item                  # x
                        + T * H * res_item               # residual
                        + H * H * w_item                 # weight
                        + T * H * out_item               # output
                        + 3 * H * 4),                    # params
    )

    out2d = pl.pallas_call(
        functools.partial(_bert_self_output_kernel, eps=eps,
                          compute_dtype=compute_dtype),
        out_shape=jax.ShapeDtypeStruct((T, H), out_dtype),
        grid_spec=pltpu.PrefetchScalarGridSpec(
            num_scalar_prefetch=0,
            grid=grid,
            in_specs=[
                pl.BlockSpec((row_tile, H), lambda i: (i, 0)),      # x tile
                pl.BlockSpec((H, H), lambda i: (0, 0),
                             pipeline_mode=pl.Buffered(1)),         # weight (resident)
                pl.BlockSpec((3, H), lambda i: (0, 0),
                             pipeline_mode=pl.Buffered(1)),         # bias/gamma/beta
                pl.BlockSpec((row_tile, H), lambda i: (i, 0)),      # residual tile
            ],
            out_specs=pl.BlockSpec((row_tile, H), lambda i: (i, 0)),
        ),
        compiler_params=pltpu.CompilerParams(
            dimension_semantics=("parallel",),
            vmem_limit_bytes=vmem_bytes,
        ),
        cost_estimate=cost,
    )(x2d, w_c, params, res2d)

    return out2d.reshape(B, S, H)


if __name__ == "__main__":
    # Small config consistent with BertSelfOutput (dense is hidden -> hidden).
    # NOTE: real BERT H=768/1024 gives lane-dense stores; H=32 here is only a
    # correctness demo (masked partial stores), not a perf config.
    batch, seq = 2, 8
    hidden_size = 32
    eps = 1e-12

    key = jax.random.PRNGKey(0)
    k1, k2, k3, k4 = jax.random.split(key, 4)

    # Deterministic synthetic parameters.
    w = jax.random.normal(k1, (hidden_size, hidden_size), jnp.float32) * 0.02
    b = jax.random.normal(k2, (hidden_size,), jnp.float32) * 0.02
    gamma = jnp.ones((hidden_size,), jnp.float32)
    beta = jnp.zeros((hidden_size,), jnp.float32)

    # Inputs.
    hidden_states = jax.random.normal(k3, (batch, seq, hidden_size), jnp.float32)
    input_tensor = jax.random.normal(k4, (batch, seq, hidden_size), jnp.float32)

    out = bert_self_output(hidden_states, input_tensor, w, b, gamma, beta, eps=eps)
    out = jax.block_until_ready(out)

    # Reference mirroring the kernel's precision path: bf16 x/W into the
    # matmul with f32 accumulation, bias/residual/LayerNorm all in f32.
    xb = hidden_states.astype(jnp.bfloat16)
    wb = w.astype(jnp.bfloat16)
    h_ref = jnp.einsum("bsh,hk->bsk", xb, wb,
                       preferred_element_type=jnp.float32) + b
    h_ref = h_ref + input_tensor.astype(jnp.float32)
    mu = jnp.mean(h_ref, axis=-1, keepdims=True)
    var = jnp.mean((h_ref - mu) ** 2, axis=-1, keepdims=True)
    ref = (h_ref - mu) * jax.lax.rsqrt(var + eps) * gamma + beta

    assert out.shape == (batch, seq, hidden_size)
    assert jnp.allclose(out, ref.astype(out.dtype), atol=2e-3, rtol=2e-3), \
        "mismatch vs reference"
    print("KERNEL_OK")
</pallas_src>

<mosaic_0001>
module attributes {stable_mosaic.version = 11 : i64} {
  func.func @_bert_self_output_kernel(%arg0: i32, %arg1: memref<16x32xf32, #tpu.memory_space<vmem>>, %arg2: memref<32x32xbf16, #tpu.memory_space<vmem>>, %arg3: memref<3x32xf32, #tpu.memory_space<vmem>>, %arg4: memref<16x32xf32, #tpu.memory_space<vmem>>, %arg5: memref<16x32xf32, #tpu.memory_space<vmem>>) attributes {dimension_semantics = [#tpu.dimension_semantics<parallel>], iteration_bounds = array<i64: 1>, scalar_prefetch = 0 : i64, scratch_operands = 0 : i64, tpu.core_type = #tpu.core_type<tc>, window_params = [{transform_indices = @transform_0, window_bounds = array<i64: 16, 32>}, {pipeline_mode = #tpu.pipeline_mode<synchronous>, transform_indices = @transform_1, window_bounds = array<i64: 32, 32>}, {pipeline_mode = #tpu.pipeline_mode<synchronous>, transform_indices = @transform_2, window_bounds = array<i64: 3, 32>}, {transform_indices = @transform_3, window_bounds = array<i64: 16, 32>}, {transform_indices = @transform_4, window_bounds = array<i64: 16, 32>}]} {
    %c0 = arith.constant 0 : index
    %c0_0 = arith.constant 0 : index
    %0 = vector.load %arg1[%c0, %c0_0] : memref<16x32xf32, #tpu.memory_space<vmem>>, vector<16x32xf32>
    %1 = arith.truncf %0 : vector<16x32xf32> to vector<16x32xbf16>
    %c0_1 = arith.constant 0 : index
    %c0_2 = arith.constant 0 : index
    %2 = vector.load %arg2[%c0_1, %c0_2] : memref<32x32xbf16, #tpu.memory_space<vmem>>, vector<32x32xbf16>
    %cst = arith.constant dense<0.000000e+00> : vector<16x32xf32>
    %3 = tpu.matmul %1, %2, %cst {dimension_numbers = #tpu.dot_dimension_numbers<[1], [0], [0], [1], [0, 0, 1, 1], [], []>} : vector<16x32xbf16>, vector<32x32xbf16>, vector<16x32xf32> -> vector<16x32xf32>
    %c0_3 = arith.constant 0 : index
    %c0_4 = arith.constant 0 : index
    %4 = vector.load %arg3[%c0_3, %c0_4] : memref<3x32xf32, #tpu.memory_space<vmem>>, vector<3x32xf32>
    %5 = vector.extract_strided_slice %4 {offsets = [0, 0], sizes = [1, 32], strides = [1, 1]} : vector<3x32xf32> to vector<1x32xf32>
    %6 = vector.broadcast %5 : vector<1x32xf32> to vector<16x32xf32>
    %7 = arith.addf %3, %6 : vector<16x32xf32>
    %c0_5 = arith.constant 0 : index
    %c0_6 = arith.constant 0 : index
    %8 = vector.load %arg4[%c0_5, %c0_6] : memref<16x32xf32, #tpu.memory_space<vmem>>, vector<16x32xf32>
    %9 = arith.addf %7, %8 : vector<16x32xf32>
    %cst_7 = arith.constant dense<0.000000e+00> : vector<16xf32>
    %10 = vector.multi_reduction <add>, %9, %cst_7 [1] : vector<16x32xf32> to vector<16xf32>
    %11 = vector.shape_cast %10 : vector<16xf32> to vector<16x1xf32>
    %cst_8 = arith.constant 3.200000e+01 : f32
    %12 = vector.broadcast %cst_8 : f32 to vector<16x1xf32>
    %13 = arith.divf %11, %12 : vector<16x1xf32>
    %14 = arith.mulf %9, %9 : vector<16x32xf32>
    %cst_9 = arith.constant dense<0.000000e+00> : vector<16xf32>
    %15 = vector.multi_reduction <add>, %14, %cst_9 [1] : vector<16x32xf32> to vector<16xf32>
    %16 = vector.shape_cast %15 : vector<16xf32> to vector<16x1xf32>
    %cst_10 = arith.constant 3.200000e+01 : f32
    %17 = vector.broadcast %cst_10 : f32 to vector<16x1xf32>
    %18 = arith.divf %16, %17 : vector<16x1xf32>
    %19 = arith.mulf %13, %13 : vector<16x1xf32>
    %20 = arith.subf %18, %19 : vector<16x1xf32>
    %cst_11 = arith.constant 0.000000e+00 : f32
    %21 = vector.broadcast %cst_11 : f32 to vector<16x1xf32>
    %22 = arith.maximumf %20, %21 : vector<16x1xf32>
    %23 = vector.broadcast %13 : vector<16x1xf32> to vector<16x32xf32>
    %24 = arith.subf %9, %23 : vector<16x32xf32>
    %cst_12 = arith.constant 9.99999996E-13 : f32
    %25 = vector.broadcast %cst_12 : f32 to vector<16x1xf32>
    %26 = arith.addf %22, %25 : vector<16x1xf32>
    %27 = math.rsqrt %26 : vector<16x1xf32>
    %28 = vector.broadcast %27 : vector<16x1xf32> to vector<16x32xf32>
    %29 = arith.mulf %24, %28 : vector<16x32xf32>
    %30 = vector.extract_strided_slice %4 {offsets = [1, 0], sizes = [1, 32], strides = [1, 1]} : vector<3x32xf32> to vector<1x32xf32>
    %31 = vector.broadcast %30 : vector<1x32xf32> to vector<16x32xf32>
    %32 = arith.mulf %29, %31 : vector<16x32xf32>
    %33 = vector.extract_strided_slice %4 {offsets = [2, 0], sizes = [1, 32], strides = [1, 1]} : vector<3x32xf32> to vector<1x32xf32>
    %34 = vector.broadcast %33 : vector<1x32xf32> to vector<16x32xf32>
    %35 = arith.addf %32, %34 : vector<16x32xf32>
    %c0_13 = arith.constant 0 : index
    %c0_14 = arith.constant 0 : index
    %36 = vector.load %arg5[%c0_13, %c0_14] : memref<16x32xf32, #tpu.memory_space<vmem>>, vector<16x32xf32>
    tpu.vector_store %arg5[%c0_13, %c0_14], %35 {strides = array<i32>} : memref<16x32xf32, #tpu.memory_space<vmem>>, vector<16x32xf32>,
    return
  }
  func.func @transform_0(%arg0: i32) -> (i32, i32) {
    %c0_i32 = arith.constant 0 : i32
    %c0_i32_0 = arith.constant 0 : i32
    return %arg0, %c0_i32 : i32, i32
  }
  func.func @transform_1(%arg0: i32) -> (i32, i32) {
    %c0_i32 = arith.constant 0 : i32
    %c0_i32_0 = arith.constant 0 : i32
    %c0_i32_1 = arith.constant 0 : i32
    return %c0_i32, %c0_i32_0 : i32, i32
  }
  func.func @transform_2(%arg0: i32) -> (i32, i32) {
    %c0_i32 = arith.constant 0 : i32
    %c0_i32_0 = arith.constant 0 : i32
    %c0_i32_1 = arith.constant 0 : i32
    return %c0_i32, %c0_i32_0 : i32, i32
  }
  func.func @transform_3(%arg0: i32) -> (i32, i32) {
    %c0_i32 = arith.constant 0 : i32
    %c0_i32_0 = arith.constant 0 : i32
    return %arg0, %c0_i32 : i32, i32
  }
  func.func @transform_4(%arg0: i32) -> (i32, i32) {
    %c0_i32 = arith.constant 0 : i32
    %c0_i32_0 = arith.constant 0 : i32
    return %arg0, %c0_i32 : i32, i32
  }
}

</mosaic_0001>

<bundles_post_ra>
// kernel: tpu_custom_call.1
= control target key start
LH: loop header
LB: loop body
LE: loop exit
PB: predicated region body
PF: predicated region fallthrough
CT: control target
= control target key end

     0   :  { %9 = vsyncpa [#allocation3], 0  ;;  %s424_s0 = inlined_call_operand.hbm [shape: f32[16,32], index: 0, kind: input, shape index: {}]   ;;  %s425_s1 = inlined_call_operand.hbm [shape: bf16[32,32], index: 1, kind: input, shape index: {}]   ;;  %s426_s2 = inlined_call_operand.vmem [shape: f32[3,32], index: 2, kind: input, shape index: {}]   ;;  %s427_s3 = inlined_call_operand.hbm [shape: f32[16,32], index: 3, kind: input, shape index: {}]   ;;  %s428_s4 = inlined_call_operand.hbm [shape: f32[16,32], index: 4, kind: output, shape index: {}]  }
   0x1   :  { %10 = vsyncpa [#allocation6], 0 }
   0x2   :  { %11 = vsyncpa [#allocation4], 0  ;;  %s322_s15 = smov [#allocation5]   ;;  %s228_s19 = scalar_lea.hbm %s425_s1, 256 }
   0x3   :  { %s29_s16 = sshll.u32 %s322_s15, 4  ;;  %p229_p0 = scmp.ne.s32.totalorder %s425_s1, %s228_s19  ;;  %s30_s16 = int_to_ptr.vmem [resolvable:$true] %s29_s16 }
   0x4   :  { %p232_p1 = scmp.lt.u32.totalorder %s228_s19, %s425_s1 }
   0x6   :  { %p234_p2 = pnand %p232_p1, %p229_p0 }
   0x8   :  { %237 = shalt.err (!%p234_p2)
}
   0x9   :  { %s238_s24 = scalar_lea.vmem %s30_s16, 256  ;;  %p243_p4 = scmp.lt.s32.totalorder %s30_s16, %s30_s16 }
   0xa   :  { %p239_p3 = scmp.ne.s32.totalorder %s30_s16, %s238_s24  ;;  %p244_p5 = scmp.lt.s32.totalorder %s238_s24, %s238_s24 }
   0xc   :  { %p245_p6 = por %p244_p5, %p243_p4 }
   0xe   :  { %p246_p7 = pnand %p245_p6, %p239_p3 }
  0x10   :  { %249 = shalt.err (!%p246_p7)
}
  0x11   :  { %s323_s25 = smov 64   ;;  %s324_s26 = smov 4  }
  0x12   :  { %35 = dma.hbm_to_vmem [thread:$0]  %s425_s1, 256, %s30_s16, [#allocation6], %s323_s25, %s323_s25, %s324_s26  }
  0x13   :  { %s325_s29 = smov [#allocation2]   ;;  %s250_s7 = scalar_lea.hbm %s424_s0, 256 }
  0x14   :  { %s17_s30 = sshll.u32 %s325_s29, 4  ;;  %p251_p8 = scmp.ne.s32.totalorder %s424_s0, %s250_s7  ;;  %s18_s30 = int_to_ptr.vmem [resolvable:$true] %s17_s30 }
  0x15   :  { %p254_p9 = scmp.lt.u32.totalorder %s250_s7, %s424_s0 }
  0x17   :  { %p256_p10 = pnand %p254_p9, %p251_p8 }
  0x19   :  { %259 = shalt.err (!%p256_p10)
}
  0x1a   :  { %s260_s12 = scalar_lea.vmem %s18_s30, 256  ;;  %p265_p12 = scmp.lt.s32.totalorder %s18_s30, %s18_s30 }
  0x1b   :  { %p261_p11 = scmp.ne.s32.totalorder %s18_s30, %s260_s12  ;;  %p266_p13 = scmp.lt.s32.totalorder %s260_s12, %s260_s12 }
  0x1d   :  { %p267_p0 = por %p266_p13, %p265_p12 }
  0x1f   :  { %p268_p1 = pnand %p267_p0, %p261_p11 }
  0x21   :  { %271 = shalt.err (!%p268_p1)
}
  0x22   :  { %s326_s1 = smov 128   ;;  %s327_s13 = smov 8  }
  0x23   :  { %23 = dma.hbm_to_vmem [thread:$0]  %s424_s0, 256, %s18_s30, [#allocation3], %s326_s1, %s326_s1, %s327_s13  }
  0x24   :  { %s328_s16 = smov [#allocation7]   ;;  %s272_s20 = scalar_lea.hbm %s427_s3, 256 }
  0x25   :  { %s43_s17 = sshll.u32 %s328_s16, 4  ;;  %p273_p2 = scmp.ne.s32.totalorder %s427_s3, %s272_s20  ;;  %s44_s17 = int_to_ptr.vmem [resolvable:$true] %s43_s17 }
  0x26   :  { %p276_p3 = scmp.lt.u32.totalorder %s272_s20, %s427_s3 }
  0x28   :  { %p278_p4 = pnand %p276_p3, %p273_p2 }
  0x2a   :  { %281 = shalt.err (!%p278_p4)
}
  0x2b   :  { %s282_s25 = scalar_lea.vmem %s44_s17, 256  ;;  %p287_p6 = scmp.lt.s32.totalorder %s44_s17, %s44_s17 }
  0x2c   :  { %p283_p5 = scmp.ne.s32.totalorder %s44_s17, %s282_s25  ;;  %p288_p7 = scmp.lt.s32.totalorder %s282_s25, %s282_s25 }
  0x2e   :  { %p289_p8 = por %p288_p7, %p287_p6 }
  0x30   :  { %p290_p9 = pnand %p289_p8, %p283_p5 }
  0x32   :  { %293 = shalt.err (!%p290_p9)
}
  0x33   :  { %49 = dma.hbm_to_vmem [thread:$0]  %s427_s3, 256, %s44_s17, [#allocation6], %s326_s1, %s326_s1, %s327_s13  }
  0x34   :  { %316 = dma.done.wait [#allocation3], 256  }
  0x35   :  { %317 = vsyncadd [#allocation3], 4294967040 }
  0x36   :  { %318 = dma.done.wait [#allocation6], 512  }
  0x37   :  { %319 = vsyncadd [#allocation6], 4294966784  ;;  %v329_v0 = vmov 0.0   ;;  %vm330_vm0 = vmmov 0   ;;  %v222_v1 = vld [vmem:[#allocation5] sm:$0xff]   ;;  %v223_v2 = vld [vmem:[#allocation5 + $0x8] sm:$0xff]   ;;  %v68_v6 = vlaneseq }
  0x38   :  { %204 = vmatprep.subr.bf16.mxu0 %v329_v0  ;;  %208 = vmatprep.mubr.msk.bf16.mxu0 %vm330_vm0, %v329_v0  ;;  %v60_v3 = vld [vmem:[#allocation2] sm:$0xff]  ;;  %v61_v4 = vld [vmem:[#allocation2 + $0x8] sm:$0xff]  ;;  %vm84_vm1 = vcmask 261120  }
  0x39   :  { %205 = vmatpush3.bf16.msra.mxu0 %v222_v1  ;;  %v62_v5 = vpack.c.bf16 %v61_v4, %v60_v3  ;;  %v69_v7 = vshrl.u32 %v68_v6, 7  ;;  %v67_v9 = vld [vmem:[%s426_s2] sm:$0x7]  ;;  %v130_v16 = vld [vmem:[#allocation7 + $0x8] sm:$0xff]  ;;  %s331_s2 = smov [#allocation8]  }
  0x3a   :  { %206 = vmatprep.subr.bf16.mxu0 %v329_v0  ;;  %v129_v12 = vld [vmem:[#allocation7] sm:$0xff]  ;;  %s185_s28 = sshll.u32 %s331_s2, 4  ;;  %s186_s28 = int_to_ptr.vmem [resolvable:$true] %s185_s28 }
  0x3b   :  { %v70_v8 = vsub.s32 0, %v69_v7  ;;  %v168_v43 = vsub.s32 1, %v69_v7  ;;  %v174_v44 = vsub.s32 2, %v69_v7  ;;  %s294_s29 = scalar_lea.vmem %s186_s28, 256  ;;  %p299_p11 = scmp.lt.s32.totalorder %s186_s28, %s186_s28 }
  0x3c   :  { %p295_p10 = scmp.ne.s32.totalorder %s186_s28, %s294_s29  ;;  %p300_p12 = scmp.lt.s32.totalorder %s294_s29, %s294_s29 }
  0x3d   :  { %207 = vmatpush3.bf16.msra.mxu0 %v223_v2  ;;  %v71_v10 = vrot.slane %v67_v9, %v70_v8  ;;  %v169_v45 = vrot.slane %v67_v9, %v168_v43  ;;  %v175_v48 = vrot.slane %v67_v9, %v174_v44 }
  0x3e   :  { %p301_p13 = por %p300_p12, %p299_p11 }
  0x40   :  { %209 = vmatmul.mubr.msk.bf16.vlgmr.msra.gmra.mrb[0].mxu0 %vm84_vm1, %v62_v5  ;;  %p302_p0 = pnand %p301_p13, %p295_p10 }
 0x113   :  { %v122_v11 = vpop.f32.mrb[0].mxu0 }
 0x114   :  { %v123_v13 = vadd.f32 %v122_v11, %v71_v10  ;;  %v210_v14 = vpop.f32.mrb[1].mxu0 }
 0x115   :  { %v125_v15 = vpop.f32.mrb[2].mxu0 }
 0x116   :  { %v131_v17 = vadd.f32 %v129_v12, %v123_v13  ;;  %v126_v18 = vadd.f32 %v125_v15, %v71_v10  ;;  %v211_v19 = vpop.f32.mrb[3].mxu0 }
 0x118   :  { %v132_v20 = vadd.f32 %v130_v16, %v126_v18  ;;  %v133_v21 = vsel %vm84_vm1, %v131_v17, 0.0  ;;  %v142_v22 = vmul.f32 %v131_v17, %v131_v17 }
 0x119   :  { %134 = vadd.xlane.f32.xlu0 %v133_v21 }
 0x11a   :  { %v144_v23 = vsel %vm84_vm1, %v142_v22, 0.0  ;;  %v143_v24 = vmul.f32 %v132_v20, %v132_v20  ;;  %v136_v25 = vsel %vm84_vm1, %v132_v20, 0.0 }
 0x11b   :  { %145 = vadd.xlane.f32.xlu1 %v144_v23 }
 0x11c   :  { %v147_v26 = vsel %vm84_vm1, %v143_v24, 0.0 }
 0x11d   :  { %137 = vadd.xlane.f32.xlu0 %v136_v25 }
 0x11f   :  { %148 = vadd.xlane.f32.xlu1 %v147_v26 }
 0x1a6   :  { %v135_v27 = vpop.xlane.xlu0 %134 }
 0x1a7   :  { %v140_v28 = vmul.f32 0.03125, %v135_v27 }
 0x1a8   :  { %v146_v29 = vpop.xlane.xlu1 %145 }
 0x1a9   :  { %v152_v30 = vmul.f32 %v140_v28, %v140_v28  ;;  %v150_v31 = vmul.f32 0.03125, %v146_v29  ;;  %v158_v46 = vsub.f32 %v131_v17, %v140_v28 }
 0x1aa   :  { %v138_v32 = vpop.xlane.xlu0 %137 }
 0x1ab   :  { %v154_v33 = vsub.f32 %v150_v31, %v152_v30  ;;  %v141_v34 = vmul.f32 0.03125, %v138_v32 }
 0x1ac   :  { %v149_v35 = vpop.xlane.xlu1 %148 }
 0x1ad   :  { %v156_v36 = vmax.f32 %v154_v33, 0.0  ;;  %v153_v37 = vmul.f32 %v141_v34, %v141_v34  ;;  %v151_v38 = vmul.f32 0.03125, %v149_v35  ;;  %v159_v50 = vsub.f32 %v132_v20, %v141_v34 }
 0x1af   :  { %v160_v39 = vadd.f32 1e-12, %v156_v36  ;;  %v155_v40 = vsub.f32 %v151_v38, %v153_v37 }
 0x1b1   :  { %224 = vrsqrt.f32 %v160_v39  ;;  %v157_v41 = vmax.f32 %v155_v40, 0.0 }
 0x1b3   :  { %v161_v42 = vadd.f32 1e-12, %v157_v41 }
 0x1b5   :  { %226 = vrsqrt.f32 %v161_v42 }
 0x1bb   :  { %v225_v47 = vpop.eup %224 }
 0x1bc   :  { %v164_v49 = vmul.f32 %v225_v47, %v158_v46 }
 0x1be   :  { %v170_v51 = vmul.f32 %v169_v45, %v164_v49 }
 0x1bf   :  { %v227_v52 = vpop.eup %226 }
 0x1c0   :  { %v165_v53 = vmul.f32 %v227_v52, %v159_v50  ;;  %v176_v54 = vadd.f32 %v175_v48, %v170_v51 }
 0x1c2   :  { %v171_v55 = vmul.f32 %v169_v45, %v165_v53  ;;  %178 = vst.msk [vmem:[#allocation8] sm:$0xff] %vm84_vm1, %v176_v54 }
 0x1c4   :  { %v177_v56 = vadd.f32 %v175_v48, %v171_v55 }
 0x1c6   :  { %179 = vst.msk [vmem:[#allocation8 + $0x8] sm:$0xff] %vm84_vm1, %v177_v56 }
 0x1c7   :  { %305 = shalt.err (!%p302_p0)
}
 0x1c8   :  { %s306_s6 = scalar_lea.hbm %s428_s4, 256 }
 0x1c9   :  { %p307_p1 = scmp.ne.s32.totalorder %s428_s4, %s306_s6  ;;  %p310_p2 = scmp.lt.u32.totalorder %s306_s6, %s428_s4 }
 0x1cb   :  { %p312_p3 = pnand %p310_p2, %p307_p1 }
 0x1cd   :  { %315 = shalt.err (!%p312_p3)
}
 0x1ce   :  { %191 = dma.vmem_to_hbm [thread:$0]  %s186_s28, 256, %s428_s4, [#allocation4], %s326_s1, %s326_s1, %s327_s13  }
 0x1cf   :  { %320 = dma.done.wait [#allocation4], 256  }
 0x1d0   :  { %321 = vsyncadd [#allocation4], 4294967040 }
 0x1d1   :  { %195 = vsyncpa [#allocation3], 1 }
 0x1d2   :  { %196 = vsyncpa [#allocation6], 1 }
 0x1d3   :  { %197 = vsyncpa [#allocation4], 1 }

</bundles_post_ra>
